<compile_context>
chip_gen: v7x
topology: tpu7x:2x2x1
jax: 0.10.0
libtpu: 0.0.40
codegen_flags: <defaults>
</compile_context>

<pallas_src>
import functools

import jax
import jax.numpy as jnp
from jax.experimental import pallas as pl
from jax.experimental.pallas import tpu as pltpu


def _round_up(n, m):
    return (n + m - 1) // m * m


def _slab_layout(in_features):
    """Row offsets of each parameter inside the packed [64, W] f32 slab.

    Weights are stored pre-transposed ([out, in]) and biases as columns so the
    kernel's lane-dense (transposed) orientation needs no in-kernel reshuffle.
    Row offsets are 8-aligned so every slice stays inside (8,128) tiles.
    """
    return {
        "w1t": 0,    # rows  0:16, cols 0:in_features  == w1^T  (16, in)
        "w2t": 16,   # rows 16:24, cols 0:16           == w2^T  (8, 16)
        "w3t": 24,   # row  24,    cols 0:8            == w3^T  (1, 8)
        "b1": 32,    # rows 32:48, col 0               (16, 1)
        "b2": 48,    # rows 48:56, col 0               (8, 1)
        "b3": 56,    # row  56,    col 0               (1, 1)
        "rows": 64,
        "cols": max(16, in_features),
    }


def pack_params(params, lay):
    """Pack w1,b1,w2,b2,w3,b3 ([in,out] layout) into one [64, W] f32 slab."""
    in_features = params["w1"].shape[0]
    slab = jnp.zeros((lay["rows"], lay["cols"]), jnp.float32)
    slab = slab.at[lay["w1t"]:lay["w1t"] + 16, :in_features].set(params["w1"].T)
    slab = slab.at[lay["w2t"]:lay["w2t"] + 8, :16].set(params["w2"].T)
    slab = slab.at[lay["w3t"], :8].set(params["w3"].reshape(8))
    slab = slab.at[lay["b1"]:lay["b1"] + 16, 0].set(params["b1"].reshape(16))
    slab = slab.at[lay["b2"]:lay["b2"] + 8, 0].set(params["b2"].reshape(8))
    slab = slab.at[lay["b3"], 0].set(params["b3"].reshape(()))
    return slab


def _mlp_kernel(lay, in_features, x_ref, p_ref, o_ref):
    x = x_ref[...]                                            # (TB, in) f32

    # Static slices of the VMEM-resident parameter slab.
    w1t = p_ref[lay["w1t"]:lay["w1t"] + 16, 0:in_features]    # (16, in)
    w2t = p_ref[lay["w2t"]:lay["w2t"] + 8, 0:16]              # (8, 16)
    w3t = p_ref[lay["w3t"]:lay["w3t"] + 1, 0:8]               # (1, 8)
    b1 = p_ref[lay["b1"]:lay["b1"] + 16, 0:1]                 # (16, 1)
    b2 = p_ref[lay["b2"]:lay["b2"] + 8, 0:1]                  # (8, 1)
    b3 = p_ref[lay["b3"]:lay["b3"] + 1, 0:1]                  # (1, 1)

    # All layers in transposed (feature-on-sublane, batch-on-lane) orientation
    # so every intermediate is fully lane-dense.
    # Layer 1: (16,in) . (TB,in)^T -> (16,TB), + b1, ReLU
    h1t = jax.lax.dot_general(
        w1t, x, (((1,), (1,)), ((), ())),
        preferred_element_type=jnp.float32) + b1
    h1t = jnp.maximum(h1t, 0.0)

    # Layer 2: (8,16) @ (16,TB) -> (8,TB), + b2, ReLU
    h2t = jnp.dot(w2t, h1t, preferred_element_type=jnp.float32) + b2
    h2t = jnp.maximum(h2t, 0.0)

    # Layer 3: (1,8) @ (8,TB) -> (1,TB), + b3
    h3t = jnp.dot(w3t, h2t, preferred_element_type=jnp.float32) + b3

    # Numerically-stable sigmoid (EUP exp; no overflow for large |h3t|).
    z = jnp.exp(-jnp.abs(h3t))
    y = jnp.where(h3t >= 0.0, 1.0 / (1.0 + z), z / (1.0 + z))

    o_ref[...] = y.reshape(1, 1, -1)                          # lane-dense store


def mlp_forward(x, params, *, tb=None):
    """x: [B, in_features] float32. params: dict of W/b arrays ([in,out] layout)."""
    B, in_features = x.shape
    lay = _slab_layout(in_features)
    slab = pack_params(params, lay)

    b_rows = _round_up(max(B, 1), 128)
    if tb is None:
        # HBM-bound: make the per-tile x DMA large relative to the ~0.35us
        # per-grid-step overhead.
        tb = min(8192, b_rows)
        # If everything fits in one tile but the batch is big, split in two so
        # the "parallel" axis can shard across both TensorCores on v7x
        # (neutral on single-TC v5e/v6e).
        if tb == b_rows and b_rows >= 4096:
            tb = _round_up((b_rows + 1) // 2, 128)
    else:
        tb = _round_up(tb, 128)

    b_pad = _round_up(B, tb)
    if b_pad != B:
        x = jnp.pad(x, ((0, b_pad - B), (0, 0)))
    num_tiles = b_pad // tb

    x_spec = pl.BlockSpec((tb, in_features), lambda i: (i, 0))
    if num_tiles >= 3:
        # Triple-buffer the x stream to smooth HBM utilisation across steps.
        try:
            x_spec = pl.BlockSpec((tb, in_features), lambda i: (i, 0),
                                  pipeline_mode=pl.Buffered(3))
        except TypeError:
            pass  # older JAX without pipeline_mode: keep default double-buffer

    kernel = functools.partial(_mlp_kernel, lay, in_features)

    out = pl.pallas_call(
        kernel,
        out_shape=jax.ShapeDtypeStruct((num_tiles, 1, tb), jnp.float32),
        grid=(num_tiles,),
        in_specs=[
            x_spec,
            pl.BlockSpec((lay["rows"], lay["cols"]), lambda i: (0, 0)),  # resident
        ],
        out_specs=pl.BlockSpec((1, 1, tb), lambda i: (i, 0, 0)),
        compiler_params=pltpu.CompilerParams(
            dimension_semantics=("parallel",),
            # x buffers are lane-padded to (tb,128) f32 in VMEM; budget tb=8192
            # with triple buffering + intermediates, with headroom (safe on all
            # of v5e/v6e/v7x).
            vmem_limit_bytes=32 * 1024 * 1024,
        ),
    )(x, slab)

    return out.reshape(b_pad, 1)[:B]


def init_params(key, input_size=13):
    """Deterministic init mimicking nn.Linear's U(-1/sqrt(fan_in), 1/sqrt(fan_in))."""
    sizes = [(input_size, 16), (16, 8), (8, 1)]
    params = {}
    for i, (fan_in, fan_out) in enumerate(sizes, start=1):
        key, kw, kb = jax.random.split(key, 3)
        bound = 1.0 / jnp.sqrt(float(fan_in))
        params[f"w{i}"] = jax.random.uniform(
            kw, (fan_in, fan_out), jnp.float32, -bound, bound)
        params[f"b{i}"] = jax.random.uniform(
            kb, (1, fan_out), jnp.float32, -bound, bound)
    return params


def mlp_reference(x, params):
    h1 = jnp.maximum(x @ params["w1"] + params["b1"], 0.0)
    h2 = jnp.maximum(h1 @ params["w2"] + params["b2"], 0.0)
    return jax.nn.sigmoid(h2 @ params["w3"] + params["b3"])


if __name__ == "__main__":
    key = jax.random.PRNGKey(0)
    key, kx = jax.random.split(key)

    B, INPUT_SIZE = 8, 13
    x = jax.random.normal(kx, (B, INPUT_SIZE), jnp.float32)
    params = init_params(key, INPUT_SIZE)

    out = mlp_forward(x, params)
    jax.block_until_ready(out)
    ref = mlp_reference(x, params)
    assert out.shape == (B, 1), out.shape
    assert jnp.allclose(out, ref, atol=1e-5, rtol=1e-5), (
        f"max err {jnp.max(jnp.abs(out - ref))}")

    # Multi-tile batch grid + ragged-batch padding + Buffered(3) x stream.
    key, kx2 = jax.random.split(key)
    B2 = 300
    x2 = jax.random.normal(kx2, (B2, INPUT_SIZE), jnp.float32)
    out2 = mlp_forward(x2, params, tb=128)   # 3 grid tiles, padded tail
    jax.block_until_ready(out2)
    ref2 = mlp_reference(x2, params)
    assert out2.shape == (B2, 1), out2.shape
    assert jnp.allclose(out2, ref2, atol=1e-5, rtol=1e-5), (
        f"max err {jnp.max(jnp.abs(out2 - ref2))}")

    # Auto tile selection with the >=2-tile split for larger batches.
    key, kx3 = jax.random.split(key)
    B3 = 4200
    x3 = jax.random.normal(kx3, (B3, INPUT_SIZE), jnp.float32)
    out3 = mlp_forward(x3, params)           # tb=2176, 2 tiles, padded tail
    jax.block_until_ready(out3)
    ref3 = mlp_reference(x3, params)
    assert out3.shape == (B3, 1), out3.shape
    assert jnp.allclose(out3, ref3, atol=1e-5, rtol=1e-5), (
        f"max err {jnp.max(jnp.abs(out3 - ref3))}")

    print("KERNEL_OK")
</pallas_src>

<mosaic_0001>
module attributes {stable_mosaic.version = 11 : i64} {
  func.func @_mlp_kernel(%arg0: i32, %arg1: memref<128x13xf32, #tpu.memory_space<vmem>>, %arg2: memref<64x16xf32, #tpu.memory_space<vmem>>, %arg3: memref<1x1x128xf32, #tpu.memory_space<vmem>>) attributes {dimension_semantics = [#tpu.dimension_semantics<parallel>], iteration_bounds = array<i64: 1>, scalar_prefetch = 0 : i64, scratch_operands = 0 : i64, tpu.core_type = #tpu.core_type<tc>, window_params = [{transform_indices = @transform_0, window_bounds = array<i64: 128, 13>}, {pipeline_mode = #tpu.pipeline_mode<synchronous>, transform_indices = @transform_1, window_bounds = array<i64: 64, 16>}, {transform_indices = @transform_2, window_bounds = array<i64: 1, 1, 128>}]} {
    %c0 = arith.constant 0 : index
    %c0_0 = arith.constant 0 : index
    %0 = vector.load %arg1[%c0, %c0_0] : memref<128x13xf32, #tpu.memory_space<vmem>>, vector<128x13xf32>
    %c0_1 = arith.constant 0 : index
    %c0_2 = arith.constant 0 : index
    %1 = vector.load %arg2[%c0_1, %c0_2] : memref<64x16xf32, #tpu.memory_space<vmem>>, vector<16x13xf32>
    %c16 = arith.constant 16 : index
    %c0_3 = arith.constant 0 : index
    %2 = vector.load %arg2[%c16, %c0_3] : memref<64x16xf32, #tpu.memory_space<vmem>>, vector<8x16xf32>
    %c24 = arith.constant 24 : index
    %c0_4 = arith.constant 0 : index
    %3 = vector.load %arg2[%c24, %c0_4] : memref<64x16xf32, #tpu.memory_space<vmem>>, vector<1x8xf32>
    %c32 = arith.constant 32 : index
    %c0_5 = arith.constant 0 : index
    %4 = vector.load %arg2[%c32, %c0_5] : memref<64x16xf32, #tpu.memory_space<vmem>>, vector<16x1xf32>
    %c48 = arith.constant 48 : index
    %c0_6 = arith.constant 0 : index
    %5 = vector.load %arg2[%c48, %c0_6] : memref<64x16xf32, #tpu.memory_space<vmem>>, vector<8x1xf32>
    %c56 = arith.constant 56 : index
    %c0_7 = arith.constant 0 : index
    %6 = vector.load %arg2[%c56, %c0_7] : memref<64x16xf32, #tpu.memory_space<vmem>>, vector<1x1xf32>
    %cst = arith.constant dense<0.000000e+00> : vector<16x128xf32>
    %7 = tpu.matmul %1, %0, %cst {dimension_numbers = #tpu.dot_dimension_numbers<[1], [1], [0], [0], [0, 0, 1, 0], [], []>} : vector<16x13xf32>, vector<128x13xf32>, vector<16x128xf32> -> vector<16x128xf32>
    %8 = vector.broadcast %4 : vector<16x1xf32> to vector<16x128xf32>
    %9 = arith.addf %7, %8 : vector<16x128xf32>
    %cst_8 = arith.constant 0.000000e+00 : f32
    %10 = vector.broadcast %cst_8 : f32 to vector<16x128xf32>
    %11 = arith.maximumf %9, %10 : vector<16x128xf32>
    %cst_9 = arith.constant dense<0.000000e+00> : vector<8x128xf32>
    %12 = tpu.matmul %2, %11, %cst_9 {dimension_numbers = #tpu.dot_dimension_numbers<[1], [0], [0], [1], [0, 0, 1, 1], [], []>} : vector<8x16xf32>, vector<16x128xf32>, vector<8x128xf32> -> vector<8x128xf32>
    %13 = vector.broadcast %5 : vector<8x1xf32> to vector<8x128xf32>
    %14 = arith.addf %12, %13 : vector<8x128xf32>
    %cst_10 = arith.constant 0.000000e+00 : f32
    %15 = vector.broadcast %cst_10 : f32 to vector<8x128xf32>
    %16 = arith.maximumf %14, %15 : vector<8x128xf32>
    %cst_11 = arith.constant dense<0.000000e+00> : vector<1x128xf32>
    %17 = tpu.matmul %3, %16, %cst_11 {dimension_numbers = #tpu.dot_dimension_numbers<[1], [0], [0], [1], [0, 0, 1, 1], [], []>} : vector<1x8xf32>, vector<8x128xf32>, vector<1x128xf32> -> vector<1x128xf32>
    %18 = vector.broadcast %6 : vector<1x1xf32> to vector<1x128xf32>
    %19 = arith.addf %17, %18 : vector<1x128xf32>
    %20 = math.absf %19 : vector<1x128xf32>
    %cst_12 = arith.constant 0.000000e+00 : f32
    %21 = vector.broadcast %cst_12 : f32 to vector<1x128xf32>
    %22 = arith.subf %21, %20 : vector<1x128xf32>
    %23 = math.exp %22 : vector<1x128xf32>
    %cst_13 = arith.constant 0.000000e+00 : f32
    %24 = vector.broadcast %cst_13 : f32 to vector<1x128xf32>
    %25 = arith.cmpf oge, %19, %24 : vector<1x128xf32>
    %cst_14 = arith.constant 1.000000e+00 : f32
    %26 = vector.broadcast %cst_14 : f32 to vector<1x128xf32>
    %27 = arith.addf %26, %23 : vector<1x128xf32>
    %cst_15 = arith.constant 1.000000e+00 : f32
    %28 = vector.broadcast %cst_15 : f32 to vector<1x128xf32>
    %29 = arith.divf %28, %27 : vector<1x128xf32>
    %cst_16 = arith.constant 1.000000e+00 : f32
    %30 = vector.broadcast %cst_16 : f32 to vector<1x128xf32>
    %31 = arith.addf %30, %23 : vector<1x128xf32>
    %32 = arith.divf %23, %31 : vector<1x128xf32>
    %33 = arith.select %25, %29, %32 : vector<1x128xi1>, vector<1x128xf32>
    %34 = vector.shape_cast %33 : vector<1x128xf32> to vector<1x1x128xf32>
    %c0_17 = arith.constant 0 : index
    %c0_18 = arith.constant 0 : index
    %c0_19 = arith.constant 0 : index
    %35 = vector.load %arg3[%c0_17, %c0_18, %c0_19] : memref<1x1x128xf32, #tpu.memory_space<vmem>>, vector<1x1x128xf32>
    tpu.vector_store %arg3[%c0_17, %c0_18, %c0_19], %34 {strides = array<i32>} : memref<1x1x128xf32, #tpu.memory_space<vmem>>, vector<1x1x128xf32>,
    return
  }
  func.func @transform_0(%arg0: i32) -> (i32, i32) {
    %c0_i32 = arith.constant 0 : i32
    %c0_i32_0 = arith.constant 0 : i32
    return %arg0, %c0_i32 : i32, i32
  }
  func.func @transform_1(%arg0: i32) -> (i32, i32) {
    %c0_i32 = arith.constant 0 : i32
    %c0_i32_0 = arith.constant 0 : i32
    %c0_i32_1 = arith.constant 0 : i32
    return %c0_i32, %c0_i32_0 : i32, i32
  }
  func.func @transform_2(%arg0: i32) -> (i32, i32, i32) {
    %c0_i32 = arith.constant 0 : i32
    %c0_i32_0 = arith.constant 0 : i32
    %c0_i32_1 = arith.constant 0 : i32
    return %arg0, %c0_i32, %c0_i32_0 : i32, i32, i32
  }
}

</mosaic_0001>

<bundles_post_ra>
// kernel: tpu_custom_call.1
= control target key start
LH: loop header
LB: loop body
LE: loop exit
PB: predicated region body
PF: predicated region fallthrough
CT: control target
= control target key end

     0   :  { %vm46_vm0 = vcmask 105472   ;;  %v538_v6 = vmov 0   ;;  %s684_s0 = inlined_call_operand.vmem [shape: f32[128,13], index: 0, kind: input, shape index: {}]   ;;  %s685_s1 = inlined_call_operand.vmem [shape: f32[64,16], index: 1, kind: input, shape index: {}]   ;;  %s686_s2 = inlined_call_operand.hbm [shape: f32[1,1,128], index: 2, kind: output, shape index: {}]  }
   0x1   :  { %v12_v0 = vld [vmem:[%s684_s0] sm:$0xff]  ;;  %v13_v1 = vld [vmem:[%s684_s0 + $0x8] sm:$0xff]  ;;  %v14_v2 = vld [vmem:[%s684_s0 + $0x10] sm:$0xff]  ;;  %508 = vset.pattern.permute.xlu0 %v538_v6  ;;  %509 = vset.pattern.permute.xlu1 %v538_v6 }
   0x2   :  { %v452_v3 = vpack.c.bf16 %v13_v1, %v12_v0  ;;  %vm569_vm1 = vmpackc.low %vm46_vm0, %vm46_vm0  ;;  %v15_v5 = vld [vmem:[%s684_s0 + $0x18] sm:$0xff]  ;;  %v28_v8 = vld [vmem:[%s685_s1] sm:$0xff] }
   0x3   :  { %v458_v7 = vpack.c.bf16 %v15_v5, %v14_v2  ;;  %v16_v9 = vld [vmem:[%s684_s0 + $0x20] sm:$0xff]  ;;  %v17_v10 = vld [vmem:[%s684_s0 + $0x28] sm:$0xff]  ;;  %437 = vmatprep.mubr.msk.f32.mxu0 %vm46_vm0, %v28_v8 }
   0x4   :  { %454 = vmatprep.subr.msk.bf16.mxu0 %vm569_vm1, %v452_v3  ;;  %v32_v11 = vld [vmem:[%s685_s1 + $0x20] sm:$0xff] }
   0x5   :  { %457 = vmatpush3.bf16.xpose.msk.msra.mxu0 %vm569_vm1, %v452_v3  ;;  %38 = vperm.xlu0 %508, %v32_v11  }
   0x6   :  { %460 = vmatprep.subr.msk.bf16.mxu0 %vm569_vm1, %v458_v7 }
   0x7   :  { %7 = vsyncpa [#allocation3], 0  ;;  %v33_v12 = vld [vmem:[%s685_s1 + $0x28] sm:$0xff]  ;;  %v464_v13 = vpack.c.bf16 %v17_v10, %v16_v9  ;;  %v18_v14 = vld [vmem:[%s684_s0 + $0x30] sm:$0xff]  ;;  %v539_v30 = vmov 0.0|0.0   ;;  %vm540_vm2 = vmmov 0  }
   0x8   :  { %v19_v15 = vld [vmem:[%s684_s0 + $0x38] sm:$0xff]  ;;  %v20_v17 = vld [vmem:[%s684_s0 + $0x40] sm:$0xff]  ;;  %v21_v18 = vld [vmem:[%s684_s0 + $0x48] sm:$0xff]  ;;  %500 = vmatprep.subr.bf16.mxu1 %v539_v30  ;;  %v541_v31 = vmov 0.0   ;;  %vm183_vm3 = vcmask 130048   ;;  %vm263_vm4 = vcmask 64512  }
   0x9   :  { %43 = vperm.xlu0 %508, %v33_v12   ;;  %v470_v16 = vpack.c.bf16 %v19_v15, %v18_v14  ;;  %v476_v19 = vpack.c.bf16 %v21_v18, %v20_v17  ;;  %v22_v20 = vld [vmem:[%s684_s0 + $0x50] sm:$0xff]  ;;  %v23_v21 = vld [vmem:[%s684_s0 + $0x58] sm:$0xff]  ;;  %v24_v23 = vld [vmem:[%s684_s0 + $0x60] sm:$0xff]  ;;  %444 = vmatprep.mubr.msk.f32.mxu1 %vm540_vm2, %v541_v31  ;;  %s542_s28 = smov [#allocation2]  }
   0xa   :  { %v482_v22 = vpack.c.bf16 %v23_v21, %v22_v20  ;;  %v25_v24 = vld [vmem:[%s684_s0 + $0x68] sm:$0xff]  ;;  %v26_v26 = vld [vmem:[%s684_s0 + $0x70] sm:$0xff]  ;;  %v27_v27 = vld [vmem:[%s684_s0 + $0x78] sm:$0xff]  ;;  %s354_s29 = sshll.u32 %s542_s28, 4  ;;  %s355_s29 = int_to_ptr.vmem [resolvable:$true] %s354_s29 }
   0xb   :  { %v488_v25 = vpack.c.bf16 %v25_v24, %v24_v23  ;;  %v494_v28 = vpack.c.bf16 %v27_v27, %v26_v26  ;;  %v29_v29 = vld [vmem:[%s685_s1 + $0x8] sm:$0xff]  ;;  %v34_v32 = vld [vmem:[%s685_s1 + $0x30] sm:$0xff]  ;;  %v35_v33 = vld [vmem:[%s685_s1 + $0x38] sm:$0x1]  ;;  %s518_s30 = scalar_lea.vmem %s355_s29, 32  ;;  %p519_p1 = scmp.lt.s32.totalorder %s355_s29, %s355_s29 }
   0xc   :  { %180 = vperm.xlu1 %509, %v34_v32   ;;  %v30_v43 = vld [vmem:[%s685_s1 + $0x10] sm:$0xff]  ;;  %v31_v49 = vld [vmem:[%s685_s1 + $0x18] sm:$0x1]  ;;  %s514_s1 = scalar_lea.vmem %s355_s29, 16 }
   0xd   :  { %463 = vmatpush3.bf16.xpose.msk.msra.mxu0 %vm569_vm1, %v458_v7  ;;  %p515_p0 = scmp.ne.s32.totalorder %s355_s29, %s514_s1  ;;  %p520_p2 = scmp.lt.s32.totalorder %s518_s30, %s514_s1 }
   0xe   :  { %466 = vmatprep.subr.msk.bf16.mxu0 %vm569_vm1, %v464_v13 }
   0xf   :  { %p521_p3 = por %p520_p2, %p519_p1 }
  0x10   :  { %260 = vperm.xlu1 %509, %v35_v33  }
  0x11   :  { %p522_p4 = pnand %p521_p3, %p515_p0 }
  0x15   :  { %469 = vmatpush3.bf16.xpose.msk.msra.mxu0 %vm569_vm1, %v464_v13 }
  0x16   :  { %472 = vmatprep.subr.msk.bf16.mxu0 %vm569_vm1, %v470_v16 }
  0x1d   :  { %475 = vmatpush3.bf16.xpose.msk.msra.mxu0 %vm569_vm1, %v470_v16 }
  0x1e   :  { %478 = vmatprep.subr.msk.bf16.mxu0 %vm569_vm1, %v476_v19 }
  0x25   :  { %481 = vmatpush3.bf16.xpose.msk.msra.mxu0 %vm569_vm1, %v476_v19 }
  0x26   :  { %484 = vmatprep.subr.msk.bf16.mxu0 %vm569_vm1, %v482_v22 }
  0x2d   :  { %487 = vmatpush3.bf16.xpose.msk.msra.mxu0 %vm569_vm1, %v482_v22 }
  0x2e   :  { %490 = vmatprep.subr.msk.bf16.mxu0 %vm569_vm1, %v488_v25 }
  0x35   :  { %493 = vmatpush3.bf16.xpose.msk.msra.mxu0 %vm569_vm1, %v488_v25 }
  0x36   :  { %496 = vmatprep.subr.msk.bf16.mxu0 %vm569_vm1, %v494_v28 }
  0x3d   :  { %499 = vmatpush3.bf16.xpose.msk.msra.mxu0 %vm569_vm1, %v494_v28 }
  0x44   :  { %438 = vmatmul.mubr.msk.f32.vlgmr.msra.gmra.mrb[0].mxu0 %vm46_vm0, %v29_v29 }
  0x84   :  { %v39_v34 = vpop.permute.xlu0 %38 }
  0x88   :  { %v44_v35 = vpop.permute.xlu0 %43 }
  0x8b   :  { %v181_v44 = vpop.permute.xlu1 %180 }
  0x8f   :  { %v261_v50 = vpop.permute.xlu1 %260 }
 0x117   :  { %v439_v36 = vpop.f32.mrb[0].mxu0 }
 0x118   :  { %v173_v37 = vadd.f32 %v439_v36, %v44_v35  ;;  %v167_v38 = vpop.f32.mrb[1].mxu0 }
 0x119   :  { %v168_v39 = vadd.f32 %v167_v38, %v39_v34 }
 0x11a   :  { %v177_v40 = vmax.f32 %v173_v37, 0.0 }
 0x11b   :  { %v176_v41 = vmax.f32 %v168_v39, 0.0 }
 0x11d   :  { %v501_v42 = vpack.c.bf16 %v177_v40, %v176_v41 }
 0x11f   :  { %502 = vmatpush3.bf16.msra.mxu1 %v501_v42 }
 0x120   :  { %447 = vmatprep.subr.mxu1 %v541_v31 }
 0x122   :  { %445 = vmatmul.mubr.msk.f32.vlgmr.msra.gmra.mrb[0].mxu1 %vm183_vm3, %v30_v43 }
 0x123   :  { %449 = vmatprep.mubr.msk.f32.mxu1 %vm540_vm2, %v541_v31 }
 0x1f5   :  { %v253_v45 = vpop.f32.mrb[0].mxu1 }
 0x1f6   :  { %v254_v46 = vadd.f32 %v253_v45, %v181_v44  ;;  %v446_v47 = vpop.f32.mrb[1].mxu1 }
 0x1f8   :  { %v257_v48 = vmax.f32 %v254_v46, 0.0 }
 0x1fa   :  { %448 = vmatpush3.msra.mxu1 %v257_v48 }
 0x1fb   :  { %450 = vmatmul.mubr.msk.f32.vlgmr.msra.gmra.mrb[2].mxu1 %vm263_vm4, %v31_v49 }
 0x2ce   :  { %v333_v51 = vpop.f32.mrb[2].mxu1 }
 0x2cf   :  { %v334_v52 = vadd.f32 %v333_v51, %v261_v50  ;;  %v451_v53 = vpop.f32.mrb[3].mxu1 }
 0x2d1   :  { %v337_v54 = vand.u32 2147483647, %v334_v52  ;;  %vm341_vm5 = vcmp.ge.f32.partialorder %v334_v52, 0.0 }
 0x2d3   :  { %v338_v55 = vsub.f32 0.0, %v337_v54 }
 0x2d5   :  { %v339_v56 = vmul.f32 1.442695, %v338_v55 }
 0x2d7   :  { %510 = vpow2.f32 %v339_v56 }
 0x2e1   :  { %v511_v57 = vpop.eup %510 }
 0x2e2   :  { %v342_v58 = vadd.f32 1.0, %v511_v57 }
 0x2e4   :  { %512 = vrcp.f32 %v342_v58 }
 0x2ee   :  { %v513_v59 = vpop.eup %512 }
 0x2ef   :  { %v345_v60 = vmul.f32 %v513_v59, %v511_v57 }
 0x2f1   :  { %v346_v61 = vsel %vm341_vm5, %v513_v59, %v345_v60 }
 0x2f2   :  { %347 = vst [vmem:[#allocation2] sm:$0x1] %v346_v61 }
 0x2f3   :  { %525 = shalt.err (!%p522_p4)
}
 0x2f4   :  { %s526_s5 = scalar_lea.hbm %s686_s2, 16 }
 0x2f5   :  { %p527_p5 = scmp.ne.s32.totalorder %s686_s2, %s526_s5  ;;  %p530_p6 = scmp.lt.u32.totalorder %s526_s5, %s686_s2 }
 0x2f7   :  { %p532_p7 = pnand %p530_p6, %p527_p5 }
 0x2f9   :  { %535 = shalt.err (!%p532_p7)
}
 0x2fa   :  { %357 = dma.vmem_to_hbm [thread:$0]  %s355_s29, 16, %s686_s2, [#allocation3]  }
 0x2fb   :  { %536 = dma.done.wait [#allocation3], 16  }
 0x2fc   :  { %537 = vsyncadd [#allocation3], 4294967280 }
 0x2fd   :  { %361 = vsyncpa [#allocation3], 1 }

</bundles_post_ra>
